<compile_context>
chip_gen: v7x
topology: tpu7x:2x2x1
jax: 0.10.0
libtpu: 0.0.40
codegen_flags: <defaults>
</compile_context>

<pallas_src>
import math
import numpy as np
import jax
import jax.numpy as jnp
from jax.experimental import pallas as pl
from jax.experimental.pallas import tpu as pltpu


# ----------------------------------------------------------------------------
# Dense equivalent of calculate_laplacian (scipy path in the PyTorch code).
# ----------------------------------------------------------------------------
def calculate_laplacian_dense(adj):
    adj = adj + jnp.eye(adj.shape[0], dtype=adj.dtype)
    rowsum = adj.sum(axis=1)
    d_inv_sqrt = jnp.power(rowsum, -0.5)
    d_inv_sqrt = jnp.where(jnp.isinf(d_inv_sqrt), 0.0, d_inv_sqrt)
    # result[i, j] = adj[j, i] * d[i] * d[j]  (matches the scipy code path)
    norm = (adj * d_inv_sqrt[None, :]).T * d_inv_sqrt[None, :]
    return norm.astype(jnp.float32)


def _pick_batch_tile(batch, nodes, feat, units, target_rows=256,
                     vmem_cap_bytes=8 << 20):
    """Largest divisor of `batch` such that the tile stays well under VMEM,
    stopping once Bt*N reaches ~256 MXU rows.  For small batches this yields
    a single grid step (cheapest on single-TensorCore chips)."""
    per_elem = (2 * nodes * feat * 2          # xs  (bf16, double buffered)
                + 2 * nodes * units * 4 * 2   # s_pairs (f32, double buffered)
                + 2 * nodes * units * 4 * 2   # output  (f32, double buffered)
                + nodes * feat * 2)           # adjacency-matmul scratch (bf16)
    cap = max(1, vmem_cap_bytes // max(per_elem, 1))
    bt = 1
    for cand in range(1, batch + 1):
        if batch % cand != 0 or cand > cap:
            continue
        bt = cand
        if cand * nodes >= target_rows:
            break
    return bt


# ----------------------------------------------------------------------------
# Fused T-GCN cell kernel.
#
# Refs:
#   adj_ref : (3, N, N) bf16  [0] adj            (node rows, node cols)
#                             [1] adj[perm, :]   (even-then-odd rows)
#                             [2] adj[perm][:, perm]
#   xs_ref  : (Bt, N, F) bf16 packed [state | input] per node (F = U + I)
#   sp_ref  : (Bt, M, 2U) f32 state in "pairs" layout (free reshape of flat)
#   w1_ref  : (F, 2U) bf16    gc1 weights, rows ordered [state | input]
#   b1_ref  : (1, 2U) f32
#   w2_ref  : (F, U) bf16     gc2 weights, rows ordered [r_state | input]
#   b2_ref  : (1, U) f32
#   out_ref : (Bt, M, 2U) f32 new_h in "pairs" layout
#   ax_ref  : (Bt*N, F) bf16  VMEM scratch shared by gc1 and gc2 stages
# ----------------------------------------------------------------------------
def _tgcn_fused_kernel(adj_ref, xs_ref, sp_ref, w1_ref, b1_ref, w2_ref, b2_ref,
                       out_ref, ax_ref):
    f32 = jnp.float32
    bf16 = jnp.bfloat16
    Bt, N, _ = xs_ref.shape
    M = sp_ref.shape[1]
    U = sp_ref.shape[2] // 2

    a_nc = adj_ref[0]                      # (N, N) node rows, node cols
    a_pc = adj_ref[1]                      # (N, N) perm rows, node cols
    a_pp = adj_ref[2]                      # (N, N) perm rows, perm cols
    w1 = w1_ref[...]
    w2 = w2_ref[...]
    b1 = b1_ref[...]                       # (1, 2U) f32
    b2 = b2_ref[...]                       # (1, U)  f32

    def mm(a, b):
        return jnp.dot(a, b, preferred_element_type=f32)

    # ---- Stage 1: adj @ [state | input], per batch element -> scratch -----
    # (results written straight into the scratch: short live ranges, no
    #  jnp.concatenate of per-batch lists)
    for bi in range(Bt):
        ax_ref[bi * N:(bi + 1) * N, :] = mm(a_nc, xs_ref[bi]).astype(bf16)

    # ---- gc1 weight matmul, batch-folded over Bt*N MXU rows ----------------
    value = jax.nn.sigmoid(mm(ax_ref[...], w1) + b1)       # (Bt*N, 2U) f32
    # Flat-split quirk: value rows [0,M) == r, rows [M,N) == u, both already
    # in the "pairs" layout that matches state.reshape(M, 2U).

    # ---- Stage 2: adj @ [r*state | input], rows permuted even-nodes-first --
    # NOTE: rows bi*N + [0,M) / [M,N) of value are contiguous slices; for
    # N % 16 != 0 they cross sublane tiles (still correct, slightly slower).
    for bi in range(Bt):
        r = value[bi * N: bi * N + M, :]                    # (M, 2U)
        rs = (r * sp_ref[bi]).astype(bf16)                  # r_state, pairs form
        xs_b = xs_ref[bi]                                   # (N, F) bf16
        # adj[perm] @ r_state, consuming the pairs form through the two lane
        # halves of the column-permuted adjacency (no (M,2U)->(N,U) relayout).
        ax_rs = mm(a_pp[:, :M], rs[:, :U]) + mm(a_pp[:, M:], rs[:, U:])  # (N, U)
        # adj[perm] @ input, re-derived cheaply (N^2 * in_size MACs).
        ax_x = mm(a_pc, xs_b[:, U:])                                      # (N, I)
        ax_ref[bi * N:(bi + 1) * N, :U] = ax_rs.astype(bf16)
        ax_ref[bi * N:(bi + 1) * N, U:] = ax_x.astype(bf16)

    # ---- gc2 weight matmul, batch-folded ------------------------------------
    c_all = jnp.maximum(mm(ax_ref[...], w2) + b2, 0.0)      # (Bt*N, U) f32
    # Per batch element rows [0,M) = c at even nodes, [M,N) = c at odd nodes.

    # ---- GRU combine; output stays in the "pairs" layout --------------------
    for bi in range(Bt):
        u = value[bi * N + M:(bi + 1) * N, :]               # (M, 2U)
        sp = sp_ref[bi]                                     # (M, 2U)
        c_e = c_all[bi * N: bi * N + M, :]                  # (M, U) even nodes
        c_o = c_all[bi * N + M:(bi + 1) * N, :]             # (M, U) odd nodes
        out_ref[bi, :, :U] = u[:, :U] * sp[:, :U] + (1.0 - u[:, :U]) * c_e
        out_ref[bi, :, U:] = u[:, U:] * sp[:, U:] + (1.0 - u[:, U:]) * c_o


class TgcnCellPallas:
    def __init__(self, in_size, num_units, adj, num_nodes, key):
        assert num_nodes % 2 == 0, "fused kernel assumes an even node count"
        self.in_size = in_size
        self.units = num_units
        self.nodes = num_nodes

        N = num_nodes
        adj_n = calculate_laplacian_dense(adj)              # (N, N) f32 dense
        self.adj_n = adj_n                                   # kept for reference
        perm = np.concatenate([np.arange(0, N, 2), np.arange(1, N, 2)])
        a_pc = adj_n[perm, :]
        a_pp = a_pc[:, perm]
        # One stacked constant (bf16 at the MXU boundary), sliced in-kernel.
        self.adj_stack = jnp.stack([adj_n, a_pc, a_pp], axis=0).astype(jnp.bfloat16)

        U, I = num_units, in_size
        F = U + I
        k1, k2, k3, k4 = jax.random.split(key, 4)

        # PyTorch-style init; feature row order [input | state] (as in GC).
        o1 = 2 * U
        stdv1 = 1.0 / math.sqrt(o1)
        self.w1 = jax.random.uniform(k1, (F, o1), jnp.float32, -stdv1, stdv1)
        self.b1 = jax.random.uniform(k2, (1, o1), jnp.float32, -stdv1, stdv1)
        stdv2 = 1.0 / math.sqrt(U)
        self.w2 = jax.random.uniform(k3, (F, U), jnp.float32, -stdv2, stdv2)
        self.b2 = jax.random.uniform(k4, (1, U), jnp.float32, -stdv2, stdv2)

        # Kernel copies: rows reordered once to [state | input] (matching the
        # packed xs layout) and cast to bf16 for the MXU.
        self.w1_k = jnp.concatenate([self.w1[I:], self.w1[:I]], axis=0).astype(jnp.bfloat16)
        self.w2_k = jnp.concatenate([self.w2[I:], self.w2[:I]], axis=0).astype(jnp.bfloat16)
        self.b1_k = self.b1                                  # f32
        self.b2_k = self.b2                                  # f32

        self._forward = jax.jit(self._forward_impl)

    def __call__(self, inputs_flat, state_flat):
        return self._forward(inputs_flat, state_flat)

    def _forward_impl(self, inputs_flat, state_flat):
        # inputs_flat: (B, N*in_size), state_flat: (B, N*units)
        B = inputs_flat.shape[0]
        N, I, U = self.nodes, self.in_size, self.units
        M = N // 2
        F = I + U

        x = inputs_flat.reshape(B, N, I)
        s = state_flat.reshape(B, N, U)
        # Lane-packed per-node features [state | input] for the adjacency
        # matmul path (bf16 at the MXU boundary).
        xs = jnp.concatenate([s, x], axis=-1).astype(jnp.bfloat16)     # (B, N, F)
        # State in the "pairs" layout: a FREE reshape of the flat state.
        s_pairs = state_flat.reshape(B, M, 2 * U)                      # (B, M, 2U)

        bt = _pick_batch_tile(B, N, F, U)
        grid = (B // bt,)

        out = pl.pallas_call(
            _tgcn_fused_kernel,
            out_shape=jax.ShapeDtypeStruct((B, M, 2 * U), jnp.float32),
            grid=grid,
            in_specs=[
                pl.BlockSpec((3, N, N), lambda g: (0, 0, 0)),       # adjacency stack
                pl.BlockSpec((bt, N, F), lambda g: (g, 0, 0)),      # packed [state|input]
                pl.BlockSpec((bt, M, 2 * U), lambda g: (g, 0, 0)),  # state, pairs layout
                pl.BlockSpec((F, 2 * U), lambda g: (0, 0)),         # w1
                pl.BlockSpec((1, 2 * U), lambda g: (0, 0)),         # b1
                pl.BlockSpec((F, U), lambda g: (0, 0)),             # w2
                pl.BlockSpec((1, U), lambda g: (0, 0)),             # b2
            ],
            out_specs=pl.BlockSpec((bt, M, 2 * U), lambda g: (g, 0, 0)),
            scratch_shapes=[pltpu.VMEM((bt * N, F), jnp.bfloat16)],
            compiler_params=pltpu.CompilerParams(
                dimension_semantics=("parallel",)),
        )(self.adj_stack, xs, s_pairs, self.w1_k, self.b1_k, self.w2_k, self.b2_k)

        # "Pairs" layout flattens for free to the flat new_h.
        new_h = out.reshape(B, N * U)
        return new_h, new_h


# ----------------------------------------------------------------------------
# Pure-JAX reference (same math, same flat-split quirk, same bf16 rounding
# points at the matmul boundaries) for validation.
# ----------------------------------------------------------------------------
def reference_forward(cell, inputs_flat, state_flat):
    B = inputs_flat.shape[0]
    N, I, U = cell.nodes, cell.in_size, cell.units
    bf16 = jnp.bfloat16
    adj = cell.adj_n.astype(bf16)
    w1 = cell.w1.astype(bf16)
    w2 = cell.w2.astype(bf16)
    inp = inputs_flat.reshape(B, N, I)

    def gc(state_like_flat, w, b, O):
        xs = jnp.concatenate([inp, state_like_flat.reshape(B, N, -1)],
                             axis=2).astype(bf16)
        ax = jnp.einsum('nm,bmf->bnf', adj, xs,
                        preferred_element_type=jnp.float32).astype(bf16)
        out = jnp.einsum('bnf,fo->bno', ax, w,
                         preferred_element_type=jnp.float32) + b.reshape(1, 1, O)
        return out.reshape(B, N * O)

    value = jax.nn.sigmoid(gc(state_flat, w1, cell.b1, 2 * U))
    r = value[:, :N * U]
    u = value[:, N * U:]
    r_state = r * state_flat
    c = jax.nn.relu(gc(r_state, w2, cell.b2, U))
    new_h = u * state_flat + (1.0 - u) * c
    return new_h


if __name__ == "__main__":
    num_nodes = 16
    in_size = 4
    num_units = 32
    batch = 4

    key = jax.random.PRNGKey(0)
    k_adj, k_in, k_st, k_params = jax.random.split(key, 4)

    # Deterministic synthetic symmetric binary adjacency.
    a = (jax.random.uniform(k_adj, (num_nodes, num_nodes)) > 0.7).astype(jnp.float32)
    adj = jnp.maximum(a, a.T)
    adj = adj * (1.0 - jnp.eye(num_nodes, dtype=jnp.float32))

    inputs = jax.random.normal(k_in, (batch, num_nodes * in_size), dtype=jnp.float32)
    state = jax.random.normal(k_st, (batch, num_nodes * num_units), dtype=jnp.float32)

    cell = TgcnCellPallas(in_size, num_units, adj, num_nodes, k_params)

    new_h, _ = cell(inputs, state)
    new_h = jax.block_until_ready(new_h)

    ref = jax.block_until_ready(reference_forward(cell, inputs, state))
    assert new_h.shape == (batch, num_nodes * num_units)
    # bf16 MXU operands on both sides; tolerance covers accumulation-order
    # and bf16 rounding-tie differences between the kernel and the reference.
    assert np.allclose(np.asarray(new_h), np.asarray(ref), rtol=1e-2, atol=1e-2), \
        float(np.max(np.abs(np.asarray(new_h) - np.asarray(ref))))

    print("KERNEL_OK")
</pallas_src>

<mosaic_0001>
module attributes {stable_mosaic.version = 11 : i64} {
  func.func @_tgcn_fused_kernel(%arg0: i32, %arg1: memref<3x16x16xbf16, #tpu.memory_space<vmem>>, %arg2: memref<4x16x36xbf16, #tpu.memory_space<vmem>>, %arg3: memref<4x8x64xf32, #tpu.memory_space<vmem>>, %arg4: memref<36x64xbf16, #tpu.memory_space<vmem>>, %arg5: memref<1x64xf32, #tpu.memory_space<vmem>>, %arg6: memref<36x32xbf16, #tpu.memory_space<vmem>>, %arg7: memref<1x32xf32, #tpu.memory_space<vmem>>, %arg8: memref<4x8x64xf32, #tpu.memory_space<vmem>>, %arg9: memref<64x36xbf16, #tpu.memory_space<vmem>>) attributes {dimension_semantics = [#tpu.dimension_semantics<parallel>], iteration_bounds = array<i64: 1>, scalar_prefetch = 0 : i64, scratch_operands = 1 : i64, tpu.core_type = #tpu.core_type<tc>, window_params = [{pipeline_mode = #tpu.pipeline_mode<synchronous>, transform_indices = @transform_0, window_bounds = array<i64: 3, 16, 16>}, {transform_indices = @transform_1, window_bounds = array<i64: 4, 16, 36>}, {transform_indices = @transform_2, window_bounds = array<i64: 4, 8, 64>}, {pipeline_mode = #tpu.pipeline_mode<synchronous>, transform_indices = @transform_3, window_bounds = array<i64: 36, 64>}, {pipeline_mode = #tpu.pipeline_mode<synchronous>, transform_indices = @transform_4, window_bounds = array<i64: 1, 64>}, {pipeline_mode = #tpu.pipeline_mode<synchronous>, transform_indices = @transform_5, window_bounds = array<i64: 36, 32>}, {pipeline_mode = #tpu.pipeline_mode<synchronous>, transform_indices = @transform_6, window_bounds = array<i64: 1, 32>}, {transform_indices = @transform_7, window_bounds = array<i64: 4, 8, 64>}]} {
    %c0 = arith.constant 0 : index
    %c0_0 = arith.constant 0 : index
    %c0_1 = arith.constant 0 : index
    %0 = vector.load %arg1[%c0, %c0_0, %c0_1] : memref<3x16x16xbf16, #tpu.memory_space<vmem>>, vector<1x16x16xbf16>
    %1 = vector.shape_cast %0 : vector<1x16x16xbf16> to vector<16x16xbf16>
    %c1 = arith.constant 1 : index
    %c0_2 = arith.constant 0 : index
    %c0_3 = arith.constant 0 : index
    %2 = vector.load %arg1[%c1, %c0_2, %c0_3] : memref<3x16x16xbf16, #tpu.memory_space<vmem>>, vector<1x16x16xbf16>
    %3 = vector.shape_cast %2 : vector<1x16x16xbf16> to vector<16x16xbf16>
    %c2 = arith.constant 2 : index
    %c0_4 = arith.constant 0 : index
    %c0_5 = arith.constant 0 : index
    %4 = vector.load %arg1[%c2, %c0_4, %c0_5] : memref<3x16x16xbf16, #tpu.memory_space<vmem>>, vector<1x16x16xbf16>
    %5 = vector.shape_cast %4 : vector<1x16x16xbf16> to vector<16x16xbf16>
    %c0_6 = arith.constant 0 : index
    %c0_7 = arith.constant 0 : index
    %6 = vector.load %arg4[%c0_6, %c0_7] : memref<36x64xbf16, #tpu.memory_space<vmem>>, vector<36x64xbf16>
    %c0_8 = arith.constant 0 : index
    %c0_9 = arith.constant 0 : index
    %7 = vector.load %arg6[%c0_8, %c0_9] : memref<36x32xbf16, #tpu.memory_space<vmem>>, vector<36x32xbf16>
    %c0_10 = arith.constant 0 : index
    %c0_11 = arith.constant 0 : index
    %8 = vector.load %arg5[%c0_10, %c0_11] : memref<1x64xf32, #tpu.memory_space<vmem>>, vector<1x64xf32>
    %c0_12 = arith.constant 0 : index
    %c0_13 = arith.constant 0 : index
    %9 = vector.load %arg7[%c0_12, %c0_13] : memref<1x32xf32, #tpu.memory_space<vmem>>, vector<1x32xf32>
    %c0_14 = arith.constant 0 : index
    %c0_15 = arith.constant 0 : index
    %c0_16 = arith.constant 0 : index
    %10 = vector.load %arg2[%c0_14, %c0_15, %c0_16] : memref<4x16x36xbf16, #tpu.memory_space<vmem>>, vector<1x16x36xbf16>
    %11 = vector.shape_cast %10 : vector<1x16x36xbf16> to vector<16x36xbf16>
    %cst = arith.constant dense<0.000000e+00> : vector<16x36xf32>
    %12 = tpu.matmul %1, %11, %cst {dimension_numbers = #tpu.dot_dimension_numbers<[1], [0], [0], [1], [0, 0, 1, 1], [], []>} : vector<16x16xbf16>, vector<16x36xbf16>, vector<16x36xf32> -> vector<16x36xf32>
    %13 = arith.truncf %12 : vector<16x36xf32> to vector<16x36xbf16>
    %c0_17 = arith.constant 0 : index
    %c0_18 = arith.constant 0 : index
    %14 = vector.load %arg9[%c0_17, %c0_18] : memref<64x36xbf16, #tpu.memory_space<vmem>>, vector<16x36xbf16>
    tpu.vector_store %arg9[%c0_17, %c0_18], %13 {strides = array<i32>} : memref<64x36xbf16, #tpu.memory_space<vmem>>, vector<16x36xbf16>,
    %c1_19 = arith.constant 1 : index
    %c0_20 = arith.constant 0 : index
    %c0_21 = arith.constant 0 : index
    %15 = vector.load %arg2[%c1_19, %c0_20, %c0_21] : memref<4x16x36xbf16, #tpu.memory_space<vmem>>, vector<1x16x36xbf16>
    %16 = vector.shape_cast %15 : vector<1x16x36xbf16> to vector<16x36xbf16>
    %cst_22 = arith.constant dense<0.000000e+00> : vector<16x36xf32>
    %17 = tpu.matmul %1, %16, %cst_22 {dimension_numbers = #tpu.dot_dimension_numbers<[1], [0], [0], [1], [0, 0, 1, 1], [], []>} : vector<16x16xbf16>, vector<16x36xbf16>, vector<16x36xf32> -> vector<16x36xf32>
    %18 = arith.truncf %17 : vector<16x36xf32> to vector<16x36xbf16>
    %c16 = arith.constant 16 : index
    %c0_23 = arith.constant 0 : index
    %19 = vector.load %arg9[%c16, %c0_23] : memref<64x36xbf16, #tpu.memory_space<vmem>>, vector<16x36xbf16>
    tpu.vector_store %arg9[%c16, %c0_23], %18 {strides = array<i32>} : memref<64x36xbf16, #tpu.memory_space<vmem>>, vector<16x36xbf16>,
    %c2_24 = arith.constant 2 : index
    %c0_25 = arith.constant 0 : index
    %c0_26 = arith.constant 0 : index
    %20 = vector.load %arg2[%c2_24, %c0_25, %c0_26] : memref<4x16x36xbf16, #tpu.memory_space<vmem>>, vector<1x16x36xbf16>
    %21 = vector.shape_cast %20 : vector<1x16x36xbf16> to vector<16x36xbf16>
    %cst_27 = arith.constant dense<0.000000e+00> : vector<16x36xf32>
    %22 = tpu.matmul %1, %21, %cst_27 {dimension_numbers = #tpu.dot_dimension_numbers<[1], [0], [0], [1], [0, 0, 1, 1], [], []>} : vector<16x16xbf16>, vector<16x36xbf16>, vector<16x36xf32> -> vector<16x36xf32>
    %23 = arith.truncf %22 : vector<16x36xf32> to vector<16x36xbf16>
    %c32 = arith.constant 32 : index
    %c0_28 = arith.constant 0 : index
    %24 = vector.load %arg9[%c32, %c0_28] : memref<64x36xbf16, #tpu.memory_space<vmem>>, vector<16x36xbf16>
    tpu.vector_store %arg9[%c32, %c0_28], %23 {strides = array<i32>} : memref<64x36xbf16, #tpu.memory_space<vmem>>, vector<16x36xbf16>,
    %c3 = arith.constant 3 : index
    %c0_29 = arith.constant 0 : index
    %c0_30 = arith.constant 0 : index
    %25 = vector.load %arg2[%c3, %c0_29, %c0_30] : memref<4x16x36xbf16, #tpu.memory_space<vmem>>, vector<1x16x36xbf16>
    %26 = vector.shape_cast %25 : vector<1x16x36xbf16> to vector<16x36xbf16>
    %cst_31 = arith.constant dense<0.000000e+00> : vector<16x36xf32>
    %27 = tpu.matmul %1, %26, %cst_31 {dimension_numbers = #tpu.dot_dimension_numbers<[1], [0], [0], [1], [0, 0, 1, 1], [], []>} : vector<16x16xbf16>, vector<16x36xbf16>, vector<16x36xf32> -> vector<16x36xf32>
    %28 = arith.truncf %27 : vector<16x36xf32> to vector<16x36xbf16>
    %c48 = arith.constant 48 : index
    %c0_32 = arith.constant 0 : index
    %29 = vector.load %arg9[%c48, %c0_32] : memref<64x36xbf16, #tpu.memory_space<vmem>>, vector<16x36xbf16>
    tpu.vector_store %arg9[%c48, %c0_32], %28 {strides = array<i32>} : memref<64x36xbf16, #tpu.memory_space<vmem>>, vector<16x36xbf16>,
    %c0_33 = arith.constant 0 : index
    %c0_34 = arith.constant 0 : index
    %30 = vector.load %arg9[%c0_33, %c0_34] : memref<64x36xbf16, #tpu.memory_space<vmem>>, vector<64x36xbf16>
    %cst_35 = arith.constant dense<0.000000e+00> : vector<64x64xf32>
    %31 = tpu.matmul %30, %6, %cst_35 {dimension_numbers = #tpu.dot_dimension_numbers<[1], [0], [0], [1], [0, 0, 1, 1], [], []>} : vector<64x36xbf16>, vector<36x64xbf16>, vector<64x64xf32> -> vector<64x64xf32>
    %32 = vector.broadcast %8 : vector<1x64xf32> to vector<64x64xf32>
    %33 = arith.addf %31, %32 : vector<64x64xf32>
    %34 = arith.negf %33 : vector<64x64xf32>
    %35 = math.exp %34 : vector<64x64xf32>
    %cst_36 = arith.constant 1.000000e+00 : f32
    %36 = vector.broadcast %cst_36 : f32 to vector<64x64xf32>
    %37 = arith.addf %36, %35 : vector<64x64xf32>
    %38 = arith.divf %36, %37 : vector<64x64xf32>
    %39 = vector.extract_strided_slice %38 {offsets = [0, 0], sizes = [8, 64], strides = [1, 1]} : vector<64x64xf32> to vector<8x64xf32>
    %c0_37 = arith.constant 0 : index
    %c0_38 = arith.constant 0 : index
    %c0_39 = arith.constant 0 : index
    %40 = vector.load %arg3[%c0_37, %c0_38, %c0_39] : memref<4x8x64xf32, #tpu.memory_space<vmem>>, vector<1x8x64xf32>
    %41 = vector.shape_cast %40 : vector<1x8x64xf32> to vector<8x64xf32>
    %42 = arith.mulf %39, %41 : vector<8x64xf32>
    %43 = arith.truncf %42 : vector<8x64xf32> to vector<8x64xbf16>
    %c0_40 = arith.constant 0 : index
    %c0_41 = arith.constant 0 : index
    %c0_42 = arith.constant 0 : index
    %44 = vector.load %arg2[%c0_40, %c0_41, %c0_42] : memref<4x16x36xbf16, #tpu.memory_space<vmem>>, vector<1x16x36xbf16>
    %45 = vector.shape_cast %44 : vector<1x16x36xbf16> to vector<16x36xbf16>
    %46 = vector.extract_strided_slice %5 {offsets = [0, 0], sizes = [16, 8], strides = [1, 1]} : vector<16x16xbf16> to vector<16x8xbf16>
    %47 = vector.extract_strided_slice %43 {offsets = [0, 0], sizes = [8, 32], strides = [1, 1]} : vector<8x64xbf16> to vector<8x32xbf16>
    %cst_43 = arith.constant dense<0.000000e+00> : vector<16x32xf32>
    %48 = tpu.matmul %46, %47, %cst_43 {dimension_numbers = #tpu.dot_dimension_numbers<[1], [0], [0], [1], [0, 0, 1, 1], [], []>} : vector<16x8xbf16>, vector<8x32xbf16>, vector<16x32xf32> -> vector<16x32xf32>
    %49 = vector.extract_strided_slice %5 {offsets = [0, 8], sizes = [16, 8], strides = [1, 1]} : vector<16x16xbf16> to vector<16x8xbf16>
    %50 = vector.extract_strided_slice %43 {offsets = [0, 32], sizes = [8, 32], strides = [1, 1]} : vector<8x64xbf16> to vector<8x32xbf16>
    %cst_44 = arith.constant dense<0.000000e+00> : vector<16x32xf32>
    %51 = tpu.matmul %49, %50, %cst_44 {dimension_numbers = #tpu.dot_dimension_numbers<[1], [0], [0], [1], [0, 0, 1, 1], [], []>} : vector<16x8xbf16>, vector<8x32xbf16>, vector<16x32xf32> -> vector<16x32xf32>
    %52 = arith.addf %48, %51 : vector<16x32xf32>
    %53 = vector.extract_strided_slice %45 {offsets = [0, 32], sizes = [16, 4], strides = [1, 1]} : vector<16x36xbf16> to vector<16x4xbf16>
    %cst_45 = arith.constant dense<0.000000e+00> : vector<16x4xf32>
    %54 = tpu.matmul %3, %53, %cst_45 {dimension_numbers = #tpu.dot_dimension_numbers<[1], [0], [0], [1], [0, 0, 1, 1], [], []>} : vector<16x16xbf16>, vector<16x4xbf16>, vector<16x4xf32> -> vector<16x4xf32>
    %55 = arith.truncf %52 : vector<16x32xf32> to vector<16x32xbf16>
    %c0_46 = arith.constant 0 : index
    %c0_47 = arith.constant 0 : index
    %56 = vector.load %arg9[%c0_46, %c0_47] : memref<64x36xbf16, #tpu.memory_space<vmem>>, vector<16x32xbf16>
    tpu.vector_store %arg9[%c0_46, %c0_47], %55 {strides = array<i32>} : memref<64x36xbf16, #tpu.memory_space<vmem>>, vector<16x32xbf16>,
    %57 = arith.truncf %54 : vector<16x4xf32> to vector<16x4xbf16>
    %c0_48 = arith.constant 0 : index
    %c32_49 = arith.constant 32 : index
    %58 = vector.load %arg9[%c0_48, %c32_49] : memref<64x36xbf16, #tpu.memory_space<vmem>>, vector<16x4xbf16>
    tpu.vector_store %arg9[%c0_48, %c32_49], %57 {strides = array<i32>} : memref<64x36xbf16, #tpu.memory_space<vmem>>, vector<16x4xbf16>,
    %59 = vector.extract_strided_slice %38 {offsets = [16, 0], sizes = [8, 64], strides = [1, 1]} : vector<64x64xf32> to vector<8x64xf32>
    %c1_50 = arith.constant 1 : index
    %c0_51 = arith.constant 0 : index
    %c0_52 = arith.constant 0 : index
    %60 = vector.load %arg3[%c1_50, %c0_51, %c0_52] : memref<4x8x64xf32, #tpu.memory_space<vmem>>, vector<1x8x64xf32>
    %61 = vector.shape_cast %60 : vector<1x8x64xf32> to vector<8x64xf32>
    %62 = arith.mulf %59, %61 : vector<8x64xf32>
    %63 = arith.truncf %62 : vector<8x64xf32> to vector<8x64xbf16>
    %c1_53 = arith.constant 1 : index
    %c0_54 = arith.constant 0 : index
    %c0_55 = arith.constant 0 : index
    %64 = vector.load %arg2[%c1_53, %c0_54, %c0_55] : memref<4x16x36xbf16, #tpu.memory_space<vmem>>, vector<1x16x36xbf16>
    %65 = vector.shape_cast %64 : vector<1x16x36xbf16> to vector<16x36xbf16>
    %66 = vector.extract_strided_slice %5 {offsets = [0, 0], sizes = [16, 8], strides = [1, 1]} : vector<16x16xbf16> to vector<16x8xbf16>
    %67 = vector.extract_strided_slice %63 {offsets = [0, 0], sizes = [8, 32], strides = [1, 1]} : vector<8x64xbf16> to vector<8x32xbf16>
    %cst_56 = arith.constant dense<0.000000e+00> : vector<16x32xf32>
    %68 = tpu.matmul %66, %67, %cst_56 {dimension_numbers = #tpu.dot_dimension_numbers<[1], [0], [0], [1], [0, 0, 1, 1], [], []>} : vector<16x8xbf16>, vector<8x32xbf16>, vector<16x32xf32> -> vector<16x32xf32>
    %69 = vector.extract_strided_slice %5 {offsets = [0, 8], sizes = [16, 8], strides = [1, 1]} : vector<16x16xbf16> to vector<16x8xbf16>
    %70 = vector.extract_strided_slice %63 {offsets = [0, 32], sizes = [8, 32], strides = [1, 1]} : vector<8x64xbf16> to vector<8x32xbf16>
    %cst_57 = arith.constant dense<0.000000e+00> : vector<16x32xf32>
    %71 = tpu.matmul %69, %70, %cst_57 {dimension_numbers = #tpu.dot_dimension_numbers<[1], [0], [0], [1], [0, 0, 1, 1], [], []>} : vector<16x8xbf16>, vector<8x32xbf16>, vector<16x32xf32> -> vector<16x32xf32>
    %72 = arith.addf %68, %71 : vector<16x32xf32>
    %73 = vector.extract_strided_slice %65 {offsets = [0, 32], sizes = [16, 4], strides = [1, 1]} : vector<16x36xbf16> to vector<16x4xbf16>
    %cst_58 = arith.constant dense<0.000000e+00> : vector<16x4xf32>
    %74 = tpu.matmul %3, %73, %cst_58 {dimension_numbers = #tpu.dot_dimension_numbers<[1], [0], [0], [1], [0, 0, 1, 1], [], []>} : vector<16x16xbf16>, vector<16x4xbf16>, vector<16x4xf32> -> vector<16x4xf32>
    %75 = arith.truncf %72 : vector<16x32xf32> to vector<16x32xbf16>
    %c16_59 = arith.constant 16 : index
    %c0_60 = arith.constant 0 : index
    %76 = vector.load %arg9[%c16_59, %c0_60] : memref<64x36xbf16, #tpu.memory_space<vmem>>, vector<16x32xbf16>
    tpu.vector_store %arg9[%c16_59, %c0_60], %75 {strides = array<i32>} : memref<64x36xbf16, #tpu.memory_space<vmem>>, vector<16x32xbf16>,
    %77 = arith.truncf %74 : vector<16x4xf32> to vector<16x4xbf16>
    %c16_61 = arith.constant 16 : index
    %c32_62 = arith.constant 32 : index
    %78 = vector.load %arg9[%c16_61, %c32_62] : memref<64x36xbf16, #tpu.memory_space<vmem>>, vector<16x4xbf16>
    tpu.vector_store %arg9[%c16_61, %c32_62], %77 {strides = array<i32>} : memref<64x36xbf16, #tpu.memory_space<vmem>>, vector<16x4xbf16>,
    %79 = vector.extract_strided_slice %38 {offsets = [32, 0], sizes = [8, 64], strides = [1, 1]} : vector<64x64xf32> to vector<8x64xf32>
    %c2_63 = arith.constant 2 : index
    %c0_64 = arith.constant 0 : index
    %c0_65 = arith.constant 0 : index
    %80 = vector.load %arg3[%c2_63, %c0_64, %c0_65] : memref<4x8x64xf32, #tpu.memory_space<vmem>>, vector<1x8x64xf32>
    %81 = vector.shape_cast %80 : vector<1x8x64xf32> to vector<8x64xf32>
    %82 = arith.mulf %79, %81 : vector<8x64xf32>
    %83 = arith.truncf %82 : vector<8x64xf32> to vector<8x64xbf16>
    %c2_66 = arith.constant 2 : index
    %c0_67 = arith.constant 0 : index
    %c0_68 = arith.constant 0 : index
    %84 = vector.load %arg2[%c2_66, %c0_67, %c0_68] : memref<4x16x36xbf16, #tpu.memory_space<vmem>>, vector<1x16x36xbf16>
    %85 = vector.shape_cast %84 : vector<1x16x36xbf16> to vector<16x36xbf16>
    %86 = vector.extract_strided_slice %5 {offsets = [0, 0], sizes = [16, 8], strides = [1, 1]} : vector<16x16xbf16> to vector<16x8xbf16>
    %87 = vector.extract_strided_slice %83 {offsets = [0, 0], sizes = [8, 32], strides = [1, 1]} : vector<8x64xbf16> to vector<8x32xbf16>
    %cst_69 = arith.constant dense<0.000000e+00> : vector<16x32xf32>
    %88 = tpu.matmul %86, %87, %cst_69 {dimension_numbers = #tpu.dot_dimension_numbers<[1], [0], [0], [1], [0, 0, 1, 1], [], []>} : vector<16x8xbf16>, vector<8x32xbf16>, vector<16x32xf32> -> vector<16x32xf32>
    %89 = vector.extract_strided_slice %5 {offsets = [0, 8], sizes = [16, 8], strides = [1, 1]} : vector<16x16xbf16> to vector<16x8xbf16>
    %90 = vector.extract_strided_slice %83 {offsets = [0, 32], sizes = [8, 32], strides = [1, 1]} : vector<8x64xbf16> to vector<8x32xbf16>
    %cst_70 = arith.constant dense<0.000000e+00> : vector<16x32xf32>
    %91 = tpu.matmul %89, %90, %cst_70 {dimension_numbers = #tpu.dot_dimension_numbers<[1], [0], [0], [1], [0, 0, 1, 1], [], []>} : vector<16x8xbf16>, vector<8x32xbf16>, vector<16x32xf32> -> vector<16x32xf32>
    %92 = arith.addf %88, %91 : vector<16x32xf32>
    %93 = vector.extract_strided_slice %85 {offsets = [0, 32], sizes = [16, 4], strides = [1, 1]} : vector<16x36xbf16> to vector<16x4xbf16>
    %cst_71 = arith.constant dense<0.000000e+00> : vector<16x4xf32>
    %94 = tpu.matmul %3, %93, %cst_71 {dimension_numbers = #tpu.dot_dimension_numbers<[1], [0], [0], [1], [0, 0, 1, 1], [], []>} : vector<16x16xbf16>, vector<16x4xbf16>, vector<16x4xf32> -> vector<16x4xf32>
    %95 = arith.truncf %92 : vector<16x32xf32> to vector<16x32xbf16>
    %c32_72 = arith.constant 32 : index
    %c0_73 = arith.constant 0 : index
    %96 = vector.load %arg9[%c32_72, %c0_73] : memref<64x36xbf16, #tpu.memory_space<vmem>>, vector<16x32xbf16>
    tpu.vector_store %arg9[%c32_72, %c0_73], %95 {strides = array<i32>} : memref<64x36xbf16, #tpu.memory_space<vmem>>, vector<16x32xbf16>,
    %97 = arith.truncf %94 : vector<16x4xf32> to vector<16x4xbf16>
    %c32_74 = arith.constant 32 : index
    %c32_75 = arith.constant 32 : index
    %98 = vector.load %arg9[%c32_74, %c32_75] : memref<64x36xbf16, #tpu.memory_space<vmem>>, vector<16x4xbf16>
    tpu.vector_store %arg9[%c32_74, %c32_75], %97 {strides = array<i32>} : memref<64x36xbf16, #tpu.memory_space<vmem>>, vector<16x4xbf16>,
    %99 = vector.extract_strided_slice %38 {offsets = [48, 0], sizes = [8, 64], strides = [1, 1]} : vector<64x64xf32> to vector<8x64xf32>
    %c3_76 = arith.constant 3 : index
    %c0_77 = arith.constant 0 : index
    %c0_78 = arith.constant 0 : index
    %100 = vector.load %arg3[%c3_76, %c0_77, %c0_78] : memref<4x8x64xf32, #tpu.memory_space<vmem>>, vector<1x8x64xf32>
    %101 = vector.shape_cast %100 : vector<1x8x64xf32> to vector<8x64xf32>
    %102 = arith.mulf %99, %101 : vector<8x64xf32>
    %103 = arith.truncf %102 : vector<8x64xf32> to vector<8x64xbf16>
    %c3_79 = arith.constant 3 : index
    %c0_80 = arith.constant 0 : index
    %c0_81 = arith.constant 0 : index
    %104 = vector.load %arg2[%c3_79, %c0_80, %c0_81] : memref<4x16x36xbf16, #tpu.memory_space<vmem>>, vector<1x16x36xbf16>
    %105 = vector.shape_cast %104 : vector<1x16x36xbf16> to vector<16x36xbf16>
    %106 = vector.extract_strided_slice %5 {offsets = [0, 0], sizes = [16, 8], strides = [1, 1]} : vector<16x16xbf16> to vector<16x8xbf16>
    %107 = vector.extract_strided_slice %103 {offsets = [0, 0], sizes = [8, 32], strides = [1, 1]} : vector<8x64xbf16> to vector<8x32xbf16>
    %cst_82 = arith.constant dense<0.000000e+00> : vector<16x32xf32>
    %108 = tpu.matmul %106, %107, %cst_82 {dimension_numbers = #tpu.dot_dimension_numbers<[1], [0], [0], [1], [0, 0, 1, 1], [], []>} : vector<16x8xbf16>, vector<8x32xbf16>, vector<16x32xf32> -> vector<16x32xf32>
    %109 = vector.extract_strided_slice %5 {offsets = [0, 8], sizes = [16, 8], strides = [1, 1]} : vector<16x16xbf16> to vector<16x8xbf16>
    %110 = vector.extract_strided_slice %103 {offsets = [0, 32], sizes = [8, 32], strides = [1, 1]} : vector<8x64xbf16> to vector<8x32xbf16>
    %cst_83 = arith.constant dense<0.000000e+00> : vector<16x32xf32>
    %111 = tpu.matmul %109, %110, %cst_83 {dimension_numbers = #tpu.dot_dimension_numbers<[1], [0], [0], [1], [0, 0, 1, 1], [], []>} : vector<16x8xbf16>, vector<8x32xbf16>, vector<16x32xf32> -> vector<16x32xf32>
    %112 = arith.addf %108, %111 : vector<16x32xf32>
    %113 = vector.extract_strided_slice %105 {offsets = [0, 32], sizes = [16, 4], strides = [1, 1]} : vector<16x36xbf16> to vector<16x4xbf16>
    %cst_84 = arith.constant dense<0.000000e+00> : vector<16x4xf32>
    %114 = tpu.matmul %3, %113, %cst_84 {dimension_numbers = #tpu.dot_dimension_numbers<[1], [0], [0], [1], [0, 0, 1, 1], [], []>} : vector<16x16xbf16>, vector<16x4xbf16>, vector<16x4xf32> -> vector<16x4xf32>
    %115 = arith.truncf %112 : vector<16x32xf32> to vector<16x32xbf16>
    %c48_85 = arith.constant 48 : index
    %c0_86 = arith.constant 0 : index
    %116 = vector.load %arg9[%c48_85, %c0_86] : memref<64x36xbf16, #tpu.memory_space<vmem>>, vector<16x32xbf16>
    tpu.vector_store %arg9[%c48_85, %c0_86], %115 {strides = array<i32>} : memref<64x36xbf16, #tpu.memory_space<vmem>>, vector<16x32xbf16>,
    %117 = arith.truncf %114 : vector<16x4xf32> to vector<16x4xbf16>
    %c48_87 = arith.constant 48 : index
    %c32_88 = arith.constant 32 : index
    %118 = vector.load %arg9[%c48_87, %c32_88] : memref<64x36xbf16, #tpu.memory_space<vmem>>, vector<16x4xbf16>
    tpu.vector_store %arg9[%c48_87, %c32_88], %117 {strides = array<i32>} : memref<64x36xbf16, #tpu.memory_space<vmem>>, vector<16x4xbf16>,
    %c0_89 = arith.constant 0 : index
    %c0_90 = arith.constant 0 : index
    %119 = vector.load %arg9[%c0_89, %c0_90] : memref<64x36xbf16, #tpu.memory_space<vmem>>, vector<64x36xbf16>
    %cst_91 = arith.constant dense<0.000000e+00> : vector<64x32xf32>
    %120 = tpu.matmul %119, %7, %cst_91 {dimension_numbers = #tpu.dot_dimension_numbers<[1], [0], [0], [1], [0, 0, 1, 1], [], []>} : vector<64x36xbf16>, vector<36x32xbf16>, vector<64x32xf32> -> vector<64x32xf32>
    %121 = vector.broadcast %9 : vector<1x32xf32> to vector<64x32xf32>
    %122 = arith.addf %120, %121 : vector<64x32xf32>
    %cst_92 = arith.constant 0.000000e+00 : f32
    %123 = vector.broadcast %cst_92 : f32 to vector<64x32xf32>
    %124 = arith.maximumf %122, %123 : vector<64x32xf32>
    %125 = vector.extract_strided_slice %38 {offsets = [8, 0], sizes = [8, 64], strides = [1, 1]} : vector<64x64xf32> to vector<8x64xf32>
    %c0_93 = arith.constant 0 : index
    %c0_94 = arith.constant 0 : index
    %c0_95 = arith.constant 0 : index
    %126 = vector.load %arg3[%c0_93, %c0_94, %c0_95] : memref<4x8x64xf32, #tpu.memory_space<vmem>>, vector<1x8x64xf32>
    %127 = vector.shape_cast %126 : vector<1x8x64xf32> to vector<8x64xf32>
    %128 = vector.extract_strided_slice %124 {offsets = [0, 0], sizes = [8, 32], strides = [1, 1]} : vector<64x32xf32> to vector<8x32xf32>
    %129 = vector.extract_strided_slice %124 {offsets = [8, 0], sizes = [8, 32], strides = [1, 1]} : vector<64x32xf32> to vector<8x32xf32>
    %130 = vector.extract_strided_slice %125 {offsets = [0, 0], sizes = [8, 32], strides = [1, 1]} : vector<8x64xf32> to vector<8x32xf32>
    %131 = vector.extract_strided_slice %127 {offsets = [0, 0], sizes = [8, 32], strides = [1, 1]} : vector<8x64xf32> to vector<8x32xf32>
    %132 = arith.mulf %130, %131 : vector<8x32xf32>
    %133 = vector.extract_strided_slice %125 {offsets = [0, 0], sizes = [8, 32], strides = [1, 1]} : vector<8x64xf32> to vector<8x32xf32>
    %cst_96 = arith.constant 1.000000e+00 : f32
    %134 = vector.broadcast %cst_96 : f32 to vector<8x32xf32>
    %135 = arith.subf %134, %133 : vector<8x32xf32>
    %136 = arith.mulf %135, %128 : vector<8x32xf32>
    %137 = arith.addf %132, %136 : vector<8x32xf32>
    %c0_97 = arith.constant 0 : index
    %c0_98 = arith.constant 0 : index
    %c0_99 = arith.constant 0 : index
    %138 = vector.load %arg8[%c0_97, %c0_98, %c0_99] : memref<4x8x64xf32, #tpu.memory_space<vmem>>, vector<1x8x32xf32>
    %139 = vector.shape_cast %138 : vector<1x8x32xf32> to vector<8x32xf32>
    %140 = vector.shape_cast %137 : vector<8x32xf32> to vector<1x8x32xf32>
    tpu.vector_store %arg8[%c0_97, %c0_98, %c0_99], %140 {strides = array<i32>} : memref<4x8x64xf32, #tpu.memory_space<vmem>>, vector<1x8x32xf32>,
    %141 = vector.extract_strided_slice %125 {offsets = [0, 32], sizes = [8, 32], strides = [1, 1]} : vector<8x64xf32> to vector<8x32xf32>
    %142 = vector.extract_strided_slice %127 {offsets = [0, 32], sizes = [8, 32], strides = [1, 1]} : vector<8x64xf32> to vector<8x32xf32>
    %143 = arith.mulf %141, %142 : vector<8x32xf32>
    %144 = vector.extract_strided_slice %125 {offsets = [0, 32], sizes = [8, 32], strides = [1, 1]} : vector<8x64xf32> to vector<8x32xf32>
    %cst_100 = arith.constant 1.000000e+00 : f32
    %145 = vector.broadcast %cst_100 : f32 to vector<8x32xf32>
    %146 = arith.subf %145, %144 : vector<8x32xf32>
    %147 = arith.mulf %146, %129 : vector<8x32xf32>
    %148 = arith.addf %143, %147 : vector<8x32xf32>
    %c0_101 = arith.constant 0 : index
    %c0_102 = arith.constant 0 : index
    %c32_103 = arith.constant 32 : index
    %149 = vector.load %arg8[%c0_101, %c0_102, %c32_103] : memref<4x8x64xf32, #tpu.memory_space<vmem>>, vector<1x8x32xf32>
    %150 = vector.shape_cast %149 : vector<1x8x32xf32> to vector<8x32xf32>
    %151 = vector.shape_cast %148 : vector<8x32xf32> to vector<1x8x32xf32>
    tpu.vector_store %arg8[%c0_101, %c0_102, %c32_103], %151 {strides = array<i32>} : memref<4x8x64xf32, #tpu.memory_space<vmem>>, vector<1x8x32xf32>,
    %152 = vector.extract_strided_slice %38 {offsets = [24, 0], sizes = [8, 64], strides = [1, 1]} : vector<64x64xf32> to vector<8x64xf32>
    %c1_104 = arith.constant 1 : index
    %c0_105 = arith.constant 0 : index
    %c0_106 = arith.constant 0 : index
    %153 = vector.load %arg3[%c1_104, %c0_105, %c0_106] : memref<4x8x64xf32, #tpu.memory_space<vmem>>, vector<1x8x64xf32>
    %154 = vector.shape_cast %153 : vector<1x8x64xf32> to vector<8x64xf32>
    %155 = vector.extract_strided_slice %124 {offsets = [16, 0], sizes = [8, 32], strides = [1, 1]} : vector<64x32xf32> to vector<8x32xf32>
    %156 = vector.extract_strided_slice %124 {offsets = [24, 0], sizes = [8, 32], strides = [1, 1]} : vector<64x32xf32> to vector<8x32xf32>
    %157 = vector.extract_strided_slice %152 {offsets = [0, 0], sizes = [8, 32], strides = [1, 1]} : vector<8x64xf32> to vector<8x32xf32>
    %158 = vector.extract_strided_slice %154 {offsets = [0, 0], sizes = [8, 32], strides = [1, 1]} : vector<8x64xf32> to vector<8x32xf32>
    %159 = arith.mulf %157, %158 : vector<8x32xf32>
    %160 = vector.extract_strided_slice %152 {offsets = [0, 0], sizes = [8, 32], strides = [1, 1]} : vector<8x64xf32> to vector<8x32xf32>
    %cst_107 = arith.constant 1.000000e+00 : f32
    %161 = vector.broadcast %cst_107 : f32 to vector<8x32xf32>
    %162 = arith.subf %161, %160 : vector<8x32xf32>
    %163 = arith.mulf %162, %155 : vector<8x32xf32>
    %164 = arith.addf %159, %163 : vector<8x32xf32>
    %c1_108 = arith.constant 1 : index
    %c0_109 = arith.constant 0 : index
    %c0_110 = arith.constant 0 : index
    %165 = vector.load %arg8[%c1_108, %c0_109, %c0_110] : memref<4x8x64xf32, #tpu.memory_space<vmem>>, vector<1x8x32xf32>
    %166 = vector.shape_cast %165 : vector<1x8x32xf32> to vector<8x32xf32>
    %167 = vector.shape_cast %164 : vector<8x32xf32> to vector<1x8x32xf32>
    tpu.vector_store %arg8[%c1_108, %c0_109, %c0_110], %167 {strides = array<i32>} : memref<4x8x64xf32, #tpu.memory_space<vmem>>, vector<1x8x32xf32>,
    %168 = vector.extract_strided_slice %152 {offsets = [0, 32], sizes = [8, 32], strides = [1, 1]} : vector<8x64xf32> to vector<8x32xf32>
    %169 = vector.extract_strided_slice %154 {offsets = [0, 32], sizes = [8, 32], strides = [1, 1]} : vector<8x64xf32> to vector<8x32xf32>
    %170 = arith.mulf %168, %169 : vector<8x32xf32>
    %171 = vector.extract_strided_slice %152 {offsets = [0, 32], sizes = [8, 32], strides = [1, 1]} : vector<8x64xf32> to vector<8x32xf32>
    %cst_111 = arith.constant 1.000000e+00 : f32
    %172 = vector.broadcast %cst_111 : f32 to vector<8x32xf32>
    %173 = arith.subf %172, %171 : vector<8x32xf32>
    %174 = arith.mulf %173, %156 : vector<8x32xf32>
    %175 = arith.addf %170, %174 : vector<8x32xf32>
    %c1_112 = arith.constant 1 : index
    %c0_113 = arith.constant 0 : index
    %c32_114 = arith.constant 32 : index
    %176 = vector.load %arg8[%c1_112, %c0_113, %c32_114] : memref<4x8x64xf32, #tpu.memory_space<vmem>>, vector<1x8x32xf32>
    %177 = vector.shape_cast %176 : vector<1x8x32xf32> to vector<8x32xf32>
    %178 = vector.shape_cast %175 : vector<8x32xf32> to vector<1x8x32xf32>
    tpu.vector_store %arg8[%c1_112, %c0_113, %c32_114], %178 {strides = array<i32>} : memref<4x8x64xf32, #tpu.memory_space<vmem>>, vector<1x8x32xf32>,
    %179 = vector.extract_strided_slice %38 {offsets = [40, 0], sizes = [8, 64], strides = [1, 1]} : vector<64x64xf32> to vector<8x64xf32>
    %c2_115 = arith.constant 2 : index
    %c0_116 = arith.constant 0 : index
    %c0_117 = arith.constant 0 : index
    %180 = vector.load %arg3[%c2_115, %c0_116, %c0_117] : memref<4x8x64xf32, #tpu.memory_space<vmem>>, vector<1x8x64xf32>
    %181 = vector.shape_cast %180 : vector<1x8x64xf32> to vector<8x64xf32>
    %182 = vector.extract_strided_slice %124 {offsets = [32, 0], sizes = [8, 32], strides = [1, 1]} : vector<64x32xf32> to vector<8x32xf32>
    %183 = vector.extract_strided_slice %124 {offsets = [40, 0], sizes = [8, 32], strides = [1, 1]} : vector<64x32xf32> to vector<8x32xf32>
    %184 = vector.extract_strided_slice %179 {offsets = [0, 0], sizes = [8, 32], strides = [1, 1]} : vector<8x64xf32> to vector<8x32xf32>
    %185 = vector.extract_strided_slice %181 {offsets = [0, 0], sizes = [8, 32], strides = [1, 1]} : vector<8x64xf32> to vector<8x32xf32>
    %186 = arith.mulf %184, %185 : vector<8x32xf32>
    %187 = vector.extract_strided_slice %179 {offsets = [0, 0], sizes = [8, 32], strides = [1, 1]} : vector<8x64xf32> to vector<8x32xf32>
    %cst_118 = arith.constant 1.000000e+00 : f32
    %188 = vector.broadcast %cst_118 : f32 to vector<8x32xf32>
    %189 = arith.subf %188, %187 : vector<8x32xf32>
    %190 = arith.mulf %189, %182 : vector<8x32xf32>
    %191 = arith.addf %186, %190 : vector<8x32xf32>
    %c2_119 = arith.constant 2 : index
    %c0_120 = arith.constant 0 : index
    %c0_121 = arith.constant 0 : index
    %192 = vector.load %arg8[%c2_119, %c0_120, %c0_121] : memref<4x8x64xf32, #tpu.memory_space<vmem>>, vector<1x8x32xf32>
    %193 = vector.shape_cast %192 : vector<1x8x32xf32> to vector<8x32xf32>
    %194 = vector.shape_cast %191 : vector<8x32xf32> to vector<1x8x32xf32>
    tpu.vector_store %arg8[%c2_119, %c0_120, %c0_121], %194 {strides = array<i32>} : memref<4x8x64xf32, #tpu.memory_space<vmem>>, vector<1x8x32xf32>,
    %195 = vector.extract_strided_slice %179 {offsets = [0, 32], sizes = [8, 32], strides = [1, 1]} : vector<8x64xf32> to vector<8x32xf32>
    %196 = vector.extract_strided_slice %181 {offsets = [0, 32], sizes = [8, 32], strides = [1, 1]} : vector<8x64xf32> to vector<8x32xf32>
    %197 = arith.mulf %195, %196 : vector<8x32xf32>
    %198 = vector.extract_strided_slice %179 {offsets = [0, 32], sizes = [8, 32], strides = [1, 1]} : vector<8x64xf32> to vector<8x32xf32>
    %cst_122 = arith.constant 1.000000e+00 : f32
    %199 = vector.broadcast %cst_122 : f32 to vector<8x32xf32>
    %200 = arith.subf %199, %198 : vector<8x32xf32>
    %201 = arith.mulf %200, %183 : vector<8x32xf32>
    %202 = arith.addf %197, %201 : vector<8x32xf32>
    %c2_123 = arith.constant 2 : index
    %c0_124 = arith.constant 0 : index
    %c32_125 = arith.constant 32 : index
    %203 = vector.load %arg8[%c2_123, %c0_124, %c32_125] : memref<4x8x64xf32, #tpu.memory_space<vmem>>, vector<1x8x32xf32>
    %204 = vector.shape_cast %203 : vector<1x8x32xf32> to vector<8x32xf32>
    %205 = vector.shape_cast %202 : vector<8x32xf32> to vector<1x8x32xf32>
    tpu.vector_store %arg8[%c2_123, %c0_124, %c32_125], %205 {strides = array<i32>} : memref<4x8x64xf32, #tpu.memory_space<vmem>>, vector<1x8x32xf32>,
    %206 = vector.extract_strided_slice %38 {offsets = [56, 0], sizes = [8, 64], strides = [1, 1]} : vector<64x64xf32> to vector<8x64xf32>
    %c3_126 = arith.constant 3 : index
    %c0_127 = arith.constant 0 : index
    %c0_128 = arith.constant 0 : index
    %207 = vector.load %arg3[%c3_126, %c0_127, %c0_128] : memref<4x8x64xf32, #tpu.memory_space<vmem>>, vector<1x8x64xf32>
    %208 = vector.shape_cast %207 : vector<1x8x64xf32> to vector<8x64xf32>
    %209 = vector.extract_strided_slice %124 {offsets = [48, 0], sizes = [8, 32], strides = [1, 1]} : vector<64x32xf32> to vector<8x32xf32>
    %210 = vector.extract_strided_slice %124 {offsets = [56, 0], sizes = [8, 32], strides = [1, 1]} : vector<64x32xf32> to vector<8x32xf32>
    %211 = vector.extract_strided_slice %206 {offsets = [0, 0], sizes = [8, 32], strides = [1, 1]} : vector<8x64xf32> to vector<8x32xf32>
    %212 = vector.extract_strided_slice %208 {offsets = [0, 0], sizes = [8, 32], strides = [1, 1]} : vector<8x64xf32> to vector<8x32xf32>
    %213 = arith.mulf %211, %212 : vector<8x32xf32>
    %214 = vector.extract_strided_slice %206 {offsets = [0, 0], sizes = [8, 32], strides = [1, 1]} : vector<8x64xf32> to vector<8x32xf32>
    %cst_129 = arith.constant 1.000000e+00 : f32
    %215 = vector.broadcast %cst_129 : f32 to vector<8x32xf32>
    %216 = arith.subf %215, %214 : vector<8x32xf32>
    %217 = arith.mulf %216, %209 : vector<8x32xf32>
    %218 = arith.addf %213, %217 : vector<8x32xf32>
    %c3_130 = arith.constant 3 : index
    %c0_131 = arith.constant 0 : index
    %c0_132 = arith.constant 0 : index
    %219 = vector.load %arg8[%c3_130, %c0_131, %c0_132] : memref<4x8x64xf32, #tpu.memory_space<vmem>>, vector<1x8x32xf32>
    %220 = vector.shape_cast %219 : vector<1x8x32xf32> to vector<8x32xf32>
    %221 = vector.shape_cast %218 : vector<8x32xf32> to vector<1x8x32xf32>
    tpu.vector_store %arg8[%c3_130, %c0_131, %c0_132], %221 {strides = array<i32>} : memref<4x8x64xf32, #tpu.memory_space<vmem>>, vector<1x8x32xf32>,
    %222 = vector.extract_strided_slice %206 {offsets = [0, 32], sizes = [8, 32], strides = [1, 1]} : vector<8x64xf32> to vector<8x32xf32>
    %223 = vector.extract_strided_slice %208 {offsets = [0, 32], sizes = [8, 32], strides = [1, 1]} : vector<8x64xf32> to vector<8x32xf32>
    %224 = arith.mulf %222, %223 : vector<8x32xf32>
    %225 = vector.extract_strided_slice %206 {offsets = [0, 32], sizes = [8, 32], strides = [1, 1]} : vector<8x64xf32> to vector<8x32xf32>
    %cst_133 = arith.constant 1.000000e+00 : f32
    %226 = vector.broadcast %cst_133 : f32 to vector<8x32xf32>
    %227 = arith.subf %226, %225 : vector<8x32xf32>
    %228 = arith.mulf %227, %210 : vector<8x32xf32>
    %229 = arith.addf %224, %228 : vector<8x32xf32>
    %c3_134 = arith.constant 3 : index
    %c0_135 = arith.constant 0 : index
    %c32_136 = arith.constant 32 : index
    %230 = vector.load %arg8[%c3_134, %c0_135, %c32_136] : memref<4x8x64xf32, #tpu.memory_space<vmem>>, vector<1x8x32xf32>
    %231 = vector.shape_cast %230 : vector<1x8x32xf32> to vector<8x32xf32>
    %232 = vector.shape_cast %229 : vector<8x32xf32> to vector<1x8x32xf32>
    tpu.vector_store %arg8[%c3_134, %c0_135, %c32_136], %232 {strides = array<i32>} : memref<4x8x64xf32, #tpu.memory_space<vmem>>, vector<1x8x32xf32>,
    return
  }
  func.func @transform_0(%arg0: i32) -> (i32, i32, i32) {
    %c0_i32 = arith.constant 0 : i32
    %c0_i32_0 = arith.constant 0 : i32
    %c0_i32_1 = arith.constant 0 : i32
    %c0_i32_2 = arith.constant 0 : i32
    return %c0_i32, %c0_i32_0, %c0_i32_1 : i32, i32, i32
  }
  func.func @transform_1(%arg0: i32) -> (i32, i32, i32) {
    %c0_i32 = arith.constant 0 : i32
    %c0_i32_0 = arith.constant 0 : i32
    %c0_i32_1 = arith.constant 0 : i32
    return %arg0, %c0_i32, %c0_i32_0 : i32, i32, i32
  }
  func.func @transform_2(%arg0: i32) -> (i32, i32, i32) {
    %c0_i32 = arith.constant 0 : i32
    %c0_i32_0 = arith.constant 0 : i32
    %c0_i32_1 = arith.constant 0 : i32
    return %arg0, %c0_i32, %c0_i32_0 : i32, i32, i32
  }
  func.func @transform_3(%arg0: i32) -> (i32, i32) {
    %c0_i32 = arith.constant 0 : i32
    %c0_i32_0 = arith.constant 0 : i32
    %c0_i32_1 = arith.constant 0 : i32
    return %c0_i32, %c0_i32_0 : i32, i32
  }
  func.func @transform_4(%arg0: i32) -> (i32, i32) {
    %c0_i32 = arith.constant 0 : i32
    %c0_i32_0 = arith.constant 0 : i32
    %c0_i32_1 = arith.constant 0 : i32
    return %c0_i32, %c0_i32_0 : i32, i32
  }
  func.func @transform_5(%arg0: i32) -> (i32, i32) {
    %c0_i32 = arith.constant 0 : i32
    %c0_i32_0 = arith.constant 0 : i32
    %c0_i32_1 = arith.constant 0 : i32
    return %c0_i32, %c0_i32_0 : i32, i32
  }
  func.func @transform_6(%arg0: i32) -> (i32, i32) {
    %c0_i32 = arith.constant 0 : i32
    %c0_i32_0 = arith.constant 0 : i32
    %c0_i32_1 = arith.constant 0 : i32
    return %c0_i32, %c0_i32_0 : i32, i32
  }
  func.func @transform_7(%arg0: i32) -> (i32, i32, i32) {
    %c0_i32 = arith.constant 0 : i32
    %c0_i32_0 = arith.constant 0 : i32
    %c0_i32_1 = arith.constant 0 : i32
    return %arg0, %c0_i32, %c0_i32_0 : i32, i32, i32
  }
}

</mosaic_0001>

<bundles_post_ra>
// kernel: _forward_impl.1
= control target key start
LH: loop header
LB: loop body
LE: loop exit
PB: predicated region body
PF: predicated region fallthrough
CT: control target
= control target key end

     0   :  { %v1552_v0 = vmov 0.0   ;;  %vm1553_vm0 = vmmov 0   ;;  %vm60_vm1 = vcmask 130048   ;;  %vm301_vm2 = vcmask 1041408   ;;  %s1554_s18 = smov 96   ;;  %s1555_s9 = smov 120   ;;  %s1841_s1 = inlined_call_operand.vmem [shape: bf16[4,16,36], index: 1, kind: input, shape index: {}]   ;;  %s1842_s0 = inlined_call_operand.vmem [shape: bf16[3,16,16], index: 0, kind: input, shape index: {}]   ;;  %s1843_s3 = inlined_call_operand.vmem [shape: bf16[36,64], index: 3, kind: input, shape index: {}]   ;;  %s1844_s4 = inlined_call_operand.vmem [shape: f32[1,64], index: 4, kind: input, shape index: {}]   ;;  %s1845_s2 = inlined_call_operand.vmem [shape: f32[4,8,64], index: 2, kind: input, shape index: {}]   ;;  %s1846_s5 = inlined_call_operand.vmem [shape: bf16[36,32], index: 5, kind: input, shape index: {}]   ;;  %s1847_s6 = inlined_call_operand.vmem [shape: f32[1,32], index: 6, kind: input, shape index: {}]   ;;  %s1848_s7 = inlined_call_operand.vmem [shape: f32[4,8,64], index: 7, kind: output, shape index: {}]  }
   0x1   :  { %1356 = vmatprep.subr.bf16.mxu0 %v1552_v0  ;;  %v1503_v1 = vld [vmem:[%s1841_s1] sm:$0xff]   ;;  %1358 = vmatprep.mubr.msk.bf16.mxu0 %vm1553_vm0, %v1552_v0  ;;  %v1505_v3 = vld [vmem:[%s1841_s1 + $0x8] sm:$0xff]   ;;  %v1507_v4 = vld [vmem:[%s1841_s1 + $0x18] sm:$0xff]   ;;  %vm106_vm3 = vcmask 293888   ;;  %vm437_vm4 = vcmask 1043456   ;;  %vm433_vm5 = vcmask 64512  }
   0x2   :  { %v1504_v2 = vld [vmem:[%s1842_s0] sm:$0xff]   ;;  %1374 = vmatprep.subr.bf16.mxu1 %v1552_v0  ;;  %1376 = vmatprep.mubr.msk.bf16.mxu1 %vm1553_vm0, %v1552_v0  ;;  %v1506_v5 = vld [vmem:[%s1841_s1 + $0x10] sm:$0xff]   ;;  %v1509_v7 = vld [vmem:[%s1843_s3 + $0x8] sm:$0xff]   ;;  %vm587_vm6 = vcmask 261120   ;;  %vm594_vm7 = vcmask 294144   ;;  %vm1183_vm8 = vcmask 523520  }
   0x3   :  { %1357 = vmatpush3.bf16.msra.mxu0 %v1503_v1  ;;  %1375 = vmatpush3.bf16.msra.mxu1 %v1507_v4  ;;  %v1508_v6 = vld [vmem:[%s1843_s3] sm:$0xff]   ;;  %v1510_v8 = vld [vmem:[%s1843_s3 + $0x10] ss:$0 sps:$4 sm:$0x33]   ;;  %v1513_v35 = vld [vmem:[%s1841_s1 + $0x8] sm:$0xff]  }
   0x4   :  { %1362 = vmatprep.subr.bf16.mxu0 %v1552_v0  ;;  %1394 = vmatprep.subr.bf16.mxu1 %v1552_v0  ;;  %v303_v9 = vsel %vm301_vm2, %v1510_v8, 0  ;;  %v1512_v34 = vld [vmem:[%s1841_s1] sm:$0xff]  }
   0x5   :  { %539 = vrot.lane.b32.xlu1 %v1512_v34, %s1554_s18  ;;  %v1250_v36 = vld [vmem:[%s1844_s4] ss:$0 sm:$0xff] }
   0x6   :  { %1359 = vmatmul.mubr.msk.bf16.vlgmr.msra.gmra.mrb[0].mxu0 %vm60_vm1, %v1504_v2  ;;  %1377 = vmatmul.mubr.msk.bf16.vlgmr.msra.gmra.mrb[0].mxu1 %vm60_vm1, %v1504_v2 }
   0x7   :  { %1363 = vmatpush3.bf16.msra.mxu0 %v1505_v3  ;;  %1364 = vmatprep.mubr.msk.bf16.mxu0 %vm1553_vm0, %v1552_v0 }
   0x8   :  { %1368 = vmatprep.subr.bf16.mxu0 %v1552_v0  ;;  %1396 = vmatprep.mubr.msk.bf16.mxu1 %vm1553_vm0, %v1552_v0 }
   0x9   :  { %698 = vrot.lane.b32.xlu1 %v1513_v35, %s1554_s18 }
   0xe   :  { %1365 = vmatmul.mubr.msk.bf16.vlgmr.msra.gmra.mrb[4].mxu0 %vm60_vm1, %v1504_v2 }
   0xf   :  { %1369 = vmatpush3.bf16.msra.mxu0 %v1506_v5  ;;  %1370 = vmatprep.mubr.msk.bf16.mxu0 %vm1553_vm0, %v1552_v0 }
  0x10   :  { %1380 = vmatprep.subr.bf16.mxu0 %v1508_v6 }
  0x16   :  { %1371 = vmatmul.mubr.msk.bf16.vlgmr.msra.gmra.mrb[8].mxu0 %vm60_vm1, %v1504_v2 }
  0x17   :  { %1381 = vmatpush3.bf16.msra.mxu0 %v1508_v6 }
  0x18   :  { %1382 = vmatprep.subr.bf16.mxu0 %v1509_v7 }
  0x1b   :  { %1383 = vmatpush3.bf16.msra.mxu0 %v1509_v7 }
  0x1c   :  { %1496 = vmatprep.subr.msk.bf16.mxu0 %vm301_vm2, %v1510_v8 }
  0x1f   :  { %1385 = vmatpush3.bf16.msra.mxu0 %v303_v9 }
  0x20   :  { %1412 = vmatprep.subr.bf16.mxu0 %v1552_v0 }
  0xd9   :  { %v98_v10 = vpop.f32.mrb[0].mxu0  ;;  %v255_v15 = vpop.f32.mrb[0].mxu1 }
  0xda   :  { %v1360_v11 = vpop.f32.mrb[1].mxu0  ;;  %v1378_v16 = vpop.f32.mrb[1].mxu1 }
  0xdb   :  { %v101_v12 = vpop.f32.mrb[2].mxu0  ;;  %v258_v17 = vpop.f32.mrb[2].mxu1 }
  0xdc   :  { %v105_v13 = vpack.c.bf16 %v101_v12, %v98_v10  ;;  %v1361_v14 = vpop.f32.mrb[3].mxu0  ;;  %v262_v19 = vpack.c.bf16 %v258_v17, %v255_v15  ;;  %v1379_v20 = vpop.f32.mrb[3].mxu1 }
  0xde   :  { %107 = vst.msk [vmem:[#allocation2] sm:$0xff] %vm106_vm3, %v105_v13  ;;  %263 = vst.msk [vmem:[#allocation2 + $0x18] sm:$0xff] %vm106_vm3, %v262_v19  ;;  %v418_v13 = vld [vmem:[%s1845_s2] sm:$0xff] }
  0xe1   :  { %v151_v18 = vpop.f32.mrb[4].mxu0 }
  0xe2   :  { %v1366_v21 = vpop.f32.mrb[5].mxu0 }
  0xe3   :  { %v154_v22 = vpop.f32.mrb[6].mxu0 }
  0xe4   :  { %v158_v23 = vpack.c.bf16 %v154_v22, %v151_v18  ;;  %v1367_v24 = vpop.f32.mrb[7].mxu0  ;;  %v1272_v18 = vld [vmem:[%s1845_s2 + $0x8] sm:$0xff] }
  0xe5   :  { %v264_v25 = vld [vmem:[#allocation2] sm:$0xff]  ;;  %v267_v32 = vld [vmem:[#allocation2 + $0x18] sm:$0xff]  ;;  %v1684_v24 = vld [vmem:[%s1842_s0 + $0x10] sm:$0xff]  }
  0xe6   :  { %159 = vst.msk [vmem:[#allocation2 + $0x8] sm:$0xff] %vm106_vm3, %v158_v23  ;;  %1386 = vmatprep.mubr.msk.bf16.mxu0 %vm106_vm3, %v264_v25 }
  0xe9   :  { %v203_v26 = vpop.f32.mrb[8].mxu0 }
  0xea   :  { %v1372_v27 = vpop.f32.mrb[9].mxu0 }
  0xeb   :  { %v206_v28 = vpop.f32.mrb[10].mxu0 }
  0xec   :  { %v210_v29 = vpack.c.bf16 %v206_v28, %v203_v26  ;;  %v1373_v30 = vpop.f32.mrb[11].mxu0  ;;  %v1279_v26 = vld [vmem:[%s1845_s2 + $0x10] sm:$0xff]  ;;  %v1286_v28 = vld [vmem:[%s1845_s2 + $0x18] sm:$0xff] }
  0xed   :  { %v265_v31 = vld [vmem:[#allocation2 + $0x8] sm:$0xff] }
  0xee   :  { %1387 = vmatmul.mubr.msk.bf16.vlgmr.msra.gmra.mrb[12].mxu0 %vm106_vm3, %v265_v31  ;;  %211 = vst.msk [vmem:[#allocation2 + $0x10] sm:$0xff] %vm106_vm3, %v210_v29 }
  0xf5   :  { %v266_v33 = vld [vmem:[#allocation2 + $0x10] sm:$0xff] }
  0xf6   :  { %1390 = vmatprep.mubr.msk.bf16.mxu0 %vm106_vm3, %v266_v33 }
  0xf7   :  { %1391 = vmatmul.mubr.msk.bf16.gmra.mrb[16].mxu0 %vm106_vm3, %v267_v32 }
  0xf8   :  { %1414 = vmatprep.mubr.msk.bf16.mxu0 %vm1553_vm0, %v1552_v0 }
 0x1c1   :  { %v1388_v37 = vpop.f32.mrb[12].mxu0 }
 0x1c2   :  { %v348_v38 = vadd.f32 %v1388_v37, %v1250_v36  ;;  %v339_v39 = vpop.f32.mrb[13].mxu0  ;;  %v1514_v37 = vld [vmem:[%s1841_s1 + $0x10] sm:$0xff]  }
 0x1c3   :  { %v340_v40 = vadd.f32 %v1250_v36, %v339_v39  ;;  %v1389_v41 = vpop.f32.mrb[14].mxu0  ;;  %v1515_v39 = vld [vmem:[%s1841_s1 + $0x18] sm:$0xff]  }
 0x1c4   :  { %v1260_v42 = vmul.f32 -1.442695, %v348_v38  ;;  %v351_v43 = vadd.f32 %v1389_v41, %v1250_v36  ;;  %v342_v44 = vpop.f32.mrb[15].mxu0 }
 0x1c5   :  { %v1258_v45 = vmul.f32 -1.442695, %v340_v40  ;;  %v343_v46 = vadd.f32 %v1250_v36, %v342_v44 }
 0x1c6   :  { %1520 = vpow2.f32 %v1260_v42  ;;  %v1261_v47 = vmul.f32 -1.442695, %v351_v43 }
 0x1c7   :  { %1522 = vpow2.f32 %v1258_v45  ;;  %v1259_v48 = vmul.f32 -1.442695, %v343_v46 }
 0x1c8   :  { %1524 = vpow2.f32 %v1261_v47 }
 0x1c9   :  { %1526 = vpow2.f32 %v1259_v48  ;;  %v540_v48 = vpop.permute.xlu1 %539 }
 0x1ca   :  { %v1392_v49 = vpop.f32.mrb[16].mxu0 }
 0x1cb   :  { %v364_v50 = vadd.f32 %v1392_v49, %v1250_v36  ;;  %v355_v51 = vpop.f32.mrb[17].mxu0  ;;  %v1516_v49 = vld [vmem:[%s1842_s0 + $0x8] sm:$0xff]  }
 0x1cc   :  { %v356_v52 = vadd.f32 %v1250_v36, %v355_v51  ;;  %v1393_v53 = vpop.f32.mrb[18].mxu0 }
 0x1cd   :  { %v1264_v54 = vmul.f32 -1.442695, %v364_v50  ;;  %v367_v55 = vadd.f32 %v1393_v53, %v1250_v36  ;;  %v358_v56 = vpop.f32.mrb[19].mxu0  ;;  %v699_v50 = vpop.permute.xlu1 %698 }
 0x1ce   :  { %v1262_v57 = vmul.f32 -1.442695, %v356_v52  ;;  %v359_v58 = vadd.f32 %v1250_v36, %v358_v56 }
 0x1cf   :  { %1528 = vpow2.f32 %v1264_v54  ;;  %v1265_v59 = vmul.f32 -1.442695, %v367_v55 }
 0x1d0   :  { %v1521_v60 = vpop.eup %1520  ;;  %1530 = vpow2.f32 %v1262_v57  ;;  %v1263_v61 = vmul.f32 -1.442695, %v359_v58 }
 0x1d1   :  { %v1523_v62 = vpop.eup %1522  ;;  %1532 = vpow2.f32 %v1265_v59  ;;  %v396_v4 = vadd.f32 1.0, %v1521_v60 }
 0x1d2   :  { %v1525_v63 = vpop.eup %1524  ;;  %v394_v1 = vadd.f32 1.0, %v1523_v62  ;;  %1534 = vpow2.f32 %v1263_v61  ;;  %v1517_v61 = vld [vmem:[%s1846_s5] sm:$0xff]  }
 0x1d3   :  { %v1527_v2 = vpop.eup %1526  ;;  %v397_v3 = vadd.f32 1.0, %v1525_v63 }
 0x1d4   :  { %1536 = vrcp.f32 %v394_v1  ;;  %v395_v5 = vadd.f32 1.0, %v1527_v2 }
 0x1d5   :  { %1538 = vrcp.f32 %v397_v3 }
 0x1d6   :  { %1540 = vrcp.f32 %v395_v5 }
 0x1d7   :  { %1542 = vrcp.f32 %v396_v4  ;;  %v1519_v4 = vld [vmem:[%s1846_s5 + $0x10] ss:$0 sps:$4 sm:$0x33]  }
 0x1d9   :  { %v1529_v6 = vpop.eup %1528 }
 0x1da   :  { %v1531_v7 = vpop.eup %1530  ;;  %v400_v8 = vadd.f32 1.0, %v1529_v6 }
 0x1db   :  { %v1533_v9 = vpop.eup %1532  ;;  %v398_v10 = vadd.f32 1.0, %v1531_v7 }
 0x1dc   :  { %v1535_v11 = vpop.eup %1534  ;;  %1544 = vrcp.f32 %v400_v8  ;;  %v401_v12 = vadd.f32 1.0, %v1533_v9 }
 0x1dd   :  { %1546 = vrcp.f32 %v398_v10  ;;  %v399_v14 = vadd.f32 1.0, %v1535_v11 }
 0x1de   :  { %v1537_v15 = vpop.eup %1536  ;;  %1548 = vrcp.f32 %v401_v12 }
 0x1df   :  { %v1667_v16 = vpop.eup %1538  ;;  %1550 = vrcp.f32 %v399_v14  ;;  %v419_v17 = vmul.f32 %v1537_v15, %v418_v13 }
 0x1e0   :  { %v1672_v19 = vpop.eup %1540  ;;  %v1675_v20 = vmul.f32 %v1667_v16, %v1272_v18 }
 0x1e1   :  { %v420_v21 = vpack.c.bf16 %v419_v17, %v419_v17  ;;  %v1678_v22 = vmul.f32 %v1672_v19, %v418_v13  ;;  %v1543_v23 = vpop.eup %1542  ;;  %v1096_v13 = vsel %vm301_vm2, %v1519_v4, 0 }
 0x1e2   :  { %v598_v25 = vmul.f32 %v1543_v23, %v1272_v18 }
 0x1e3   :  { %431 = vrot.lane.b32.xlu0 %v420_v21, %s1554_s18  ;;  %v486_v44 = vsel %vm437_vm4, %v420_v21, 0 }
 0x1e4   :  { %v599_v33 = vpack.c.bf16 %v598_v25, %v598_v25 }
 0x1e6   :  { %v1545_v27 = vpop.eup %1544  ;;  %v650_v47 = vsel %vm437_vm4, %v599_v33, 0 }
 0x1e7   :  { %v1547_v29 = vpop.eup %1546  ;;  %428 = vrot.lane.b32.xlu0 %v1684_v24, %s1555_s9  ;;  %v906_v38 = vmul.f32 %v1545_v27, %v1286_v28 }
 0x1e8   :  { %v1693_v30 = vpop.eup %1548  ;;  %v752_v31 = vmul.f32 %v1547_v29, %v1279_v26 }
 0x1e9   :  { %v1695_v32 = vpop.eup %1550  ;;  %v1698_v34 = vmul.f32 %v1693_v30, %v1286_v28  ;;  %v907_v40 = vpack.c.bf16 %v906_v38, %v906_v38 }
 0x1ea   :  { %v753_v35 = vpack.c.bf16 %v752_v31, %v752_v31  ;;  %v1701_v36 = vmul.f32 %v1695_v32, %v1279_v26 }
 0x1eb   :  { %603 = vrot.lane.b32.xlu0 %v599_v33, %s1554_s18  ;;  %v958_v57 = vsel %vm437_vm4, %v907_v40, 0 }
 0x1ec   :  { %757 = vrot.lane.b32.xlu1 %v753_v35, %s1554_s18  ;;  %v804_v56 = vsel %vm437_vm4, %v753_v35, 0 }
 0x1ef   :  { %852 = vrot.lane.b32.xlu0 %v1514_v37, %s1554_s18 }
 0x1f0   :  { %1006 = vrot.lane.b32.xlu1 %v1515_v39, %s1554_s18 }
 0x1f3   :  { %911 = vrot.lane.b32.xlu0 %v907_v40, %s1554_s18  ;;  %s1556_s18 = smov 32  }
 0x255   :  { %v432_v41 = vpop.permute.xlu0 %431 }
 0x256   :  { %v439_v42 = vsel %vm437_vm4, %v432_v41, 0 }
 0x257   :  { %1395 = vmatpush3.bf16.msra.mxu1 %v439_v42 }
 0x258   :  { %1400 = vmatprep.subr.bf16.mxu1 %v1552_v0 }
 0x259   :  { %v429_v43 = vpop.permute.xlu0 %428 }
 0x25a   :  { %1397 = vmatmul.mubr.msk.bf16.vlgmr.msra.gmra.mrb[4].mxu1 %vm433_vm5, %v429_v43 }
 0x25b   :  { %1401 = vmatpush3.bf16.msra.mxu1 %v486_v44  ;;  %1402 = vmatprep.mubr.msk.bf16.mxu1 %vm1553_vm0, %v1552_v0 }
 0x25c   :  { %1406 = vmatprep.subr.bf16.mxu1 %v1552_v0 }
 0x25d   :  { %v604_v45 = vpop.permute.xlu0 %603 }
 0x25e   :  { %v606_v46 = vsel %vm437_vm4, %v604_v45, 0  ;;  %v758_v52 = vpop.permute.xlu1 %757 }
 0x25f   :  { %1413 = vmatpush3.bf16.msra.mxu0 %v606_v46  ;;  %v760_v54 = vsel %vm437_vm4, %v758_v52, 0 }
 0x260   :  { %1418 = vmatprep.subr.bf16.mxu0 %v1552_v0 }
 0x261   :  { %v853_v51 = vpop.permute.xlu0 %852 }
 0x262   :  { %1415 = vmatmul.mubr.msk.bf16.vlgmr.msra.gmra.mrb[20].mxu0 %vm433_vm5, %v429_v43  ;;  %v1007_v58 = vpop.permute.xlu1 %1006 }
 0x263   :  { %1419 = vmatpush3.bf16.msra.mxu0 %v650_v47  ;;  %1420 = vmatprep.mubr.msk.bf16.mxu0 %vm1553_vm0, %v1552_v0 }
 0x264   :  { %1442 = vmatprep.subr.bf16.mxu0 %v1552_v0 }
 0x265   :  { %v912_v53 = vpop.permute.xlu0 %911 }
 0x266   :  { %1403 = vmatmul.mubr.msk.bf16.vlgmr.msra.gmra.mrb[4].mxu1 %vm433_vm5, %v1684_v24  ;;  %v914_v55 = vsel %vm437_vm4, %v912_v53, 0 }
 0x267   :  { %1407 = vmatpush3.bf16.msra.mxu1 %v540_v48  ;;  %1408 = vmatprep.mubr.msk.bf16.mxu1 %vm1553_vm0, %v1552_v0 }
 0x268   :  { %1424 = vmatprep.subr.bf16.mxu1 %v1552_v0 }
 0x26e   :  { %1409 = vmatmul.mubr.msk.bf16.vlgmr.msra.gmra.mrb[8].mxu1 %vm60_vm1, %v1516_v49  ;;  %1421 = vmatmul.mubr.msk.bf16.vlgmr.msra.gmra.mrb[20].mxu0 %vm433_vm5, %v1684_v24 }
 0x26f   :  { %1425 = vmatpush3.bf16.msra.mxu1 %v699_v50  ;;  %1443 = vmatpush3.bf16.msra.mxu0 %v853_v51 }
 0x270   :  { %1426 = vmatprep.mubr.msk.bf16.mxu1 %vm1553_vm0, %v1552_v0  ;;  %1444 = vmatprep.mubr.msk.bf16.mxu0 %vm1553_vm0, %v1552_v0 }
 0x271   :  { %1430 = vmatprep.subr.bf16.mxu1 %v1552_v0  ;;  %1448 = vmatprep.subr.bf16.mxu0 %v1552_v0 }
 0x276   :  { %1445 = vmatmul.mubr.msk.bf16.vlgmr.msra.gmra.mrb[24].mxu0 %vm60_vm1, %v1516_v49  ;;  %1427 = vmatmul.mubr.msk.bf16.vlgmr.msra.gmra.mrb[12].mxu1 %vm60_vm1, %v1516_v49 }
 0x277   :  { %1431 = vmatpush3.bf16.msra.mxu1 %v760_v54  ;;  %1449 = vmatpush3.bf16.msra.mxu0 %v914_v55  ;;  %v1293_v55 = vld [vmem:[%s1847_s6] ss:$0 sm:$0xff] }
 0x278   :  { %1432 = vmatprep.mubr.msk.bf16.mxu1 %vm1553_vm0, %v1552_v0  ;;  %1436 = vmatprep.subr.bf16.mxu1 %v1552_v0 }
 0x279   :  { %1450 = vmatprep.mubr.msk.bf16.mxu0 %vm1553_vm0, %v1552_v0  ;;  %1454 = vmatprep.subr.bf16.mxu0 %v1552_v0 }
 0x27e   :  { %1433 = vmatmul.mubr.msk.bf16.vlgmr.msra.gmra.mrb[16].mxu1 %vm433_vm5, %v429_v43  ;;  %1451 = vmatmul.mubr.msk.bf16.vlgmr.msra.gmra.mrb[28].mxu0 %vm433_vm5, %v429_v43 }
 0x27f   :  { %1437 = vmatpush3.bf16.msra.mxu1 %v804_v56  ;;  %1455 = vmatpush3.bf16.msra.mxu0 %v958_v57 }
 0x280   :  { %1438 = vmatprep.mubr.msk.bf16.mxu1 %vm1553_vm0, %v1552_v0  ;;  %1456 = vmatprep.mubr.msk.bf16.mxu0 %vm1553_vm0, %v1552_v0 }
 0x281   :  { %1460 = vmatprep.subr.bf16.mxu1 %v1552_v0 }
 0x28a   :  { %1439 = vmatmul.mubr.msk.bf16.vlgmr.msra.gmra.mrb[16].mxu1 %vm433_vm5, %v1684_v24  ;;  %1457 = vmatmul.mubr.msk.bf16.vlgmr.msra.gmra.mrb[28].mxu0 %vm433_vm5, %v1684_v24 }
 0x28b   :  { %1461 = vmatpush3.bf16.msra.mxu1 %v1007_v58  ;;  %1462 = vmatprep.mubr.msk.bf16.mxu1 %vm1553_vm0, %v1552_v0  ;;  %v1518_v0 = vld [vmem:[%s1846_s5 + $0x8] sm:$0xff]  }
 0x28c   :  { %1466 = vmatprep.subr.bf16.mxu1 %v1517_v61 }
 0x292   :  { %1463 = vmatmul.mubr.msk.bf16.vlgmr.msra.gmra.mrb[20].mxu1 %vm60_vm1, %v1516_v49 }
 0x293   :  { %1467 = vmatpush3.bf16.msra.mxu1 %v1517_v61 }
 0x294   :  { %1468 = vmatprep.subr.bf16.mxu1 %v1518_v0 }
 0x297   :  { %1469 = vmatpush3.bf16.msra.mxu1 %v1518_v0 }
 0x298   :  { %1497 = vmatprep.subr.msk.bf16.mxu1 %vm301_vm2, %v1519_v4 }
 0x29b   :  { %1471 = vmatpush3.bf16.msra.mxu1 %v1096_v13 }
 0x339   :  { %v522_v59 = vpop.f32.mrb[4].mxu1 }
 0x33a   :  { %v1404_v60 = vpop.f32.mrb[5].mxu1 }
 0x33b   :  { %v525_v62 = vpop.f32.mrb[6].mxu1 }
 0x33c   :  { %v586_v63 = vpack.c.bf16 %v525_v62, %v522_v59  ;;  %v1405_v1 = vpop.f32.mrb[7].mxu1 }
 0x33d   :  { %v1187_v1 = vsub.f32 1.0, %v1667_v16 }
 0x33e   :  { %588 = vst.msk [vmem:[#allocation2] sm:$0xff] %vm587_vm6, %v586_v63 }
 0x341   :  { %v686_v2 = vpop.f32.mrb[20].mxu0  ;;  %v579_v3 = vpop.f32.mrb[8].mxu1 }
 0x342   :  { %v1422_v5 = vpop.f32.mrb[21].mxu0  ;;  %v1410_v6 = vpop.f32.mrb[9].mxu1 }
 0x343   :  { %v689_v7 = vpop.f32.mrb[22].mxu0  ;;  %v582_v8 = vpop.f32.mrb[10].mxu1 }
 0x344   :  { %v742_v9 = vpack.c.bf16 %v689_v7, %v686_v2  ;;  %v1423_v10 = vpop.f32.mrb[23].mxu0  ;;  %v589_v11 = vpack.c.bf16 %v582_v8, %v579_v3  ;;  %v1411_v12 = vpop.f32.mrb[11].mxu1  ;;  %v1173_v3 = vsub.f32 1.0, %v1672_v19 }
 0x346   :  { %591 = vrot.lane.b32.xlu1 %v589_v11, %s1556_s18  ;;  %743 = vst.msk [vmem:[#allocation2 + $0x8] sm:$0xff] %vm587_vm6, %v742_v9 }
 0x349   :  { %v735_v14 = vpop.f32.mrb[12].mxu1  ;;  %v889_v15 = vpop.f32.mrb[24].mxu0 }
 0x34a   :  { %v1428_v17 = vpop.f32.mrb[13].mxu1  ;;  %v1446_v18 = vpop.f32.mrb[25].mxu0 }
 0x34b   :  { %v738_v21 = vpop.f32.mrb[14].mxu1  ;;  %v892_v23 = vpop.f32.mrb[26].mxu0  ;;  %v1215_v17 = vsub.f32 1.0, %v1693_v30 }
 0x34c   :  { %v744_v24 = vpack.c.bf16 %v738_v21, %v735_v14  ;;  %v1429_v25 = vpop.f32.mrb[15].mxu1  ;;  %v898_v26 = vpack.c.bf16 %v892_v23, %v889_v15  ;;  %v1447_v27 = vpop.f32.mrb[27].mxu0  ;;  %v1201_v23 = vsub.f32 1.0, %v1695_v32 }
 0x34e   :  { %746 = vrot.lane.b32.xlu0 %v744_v24, %s1556_s18  ;;  %900 = vrot.lane.b32.xlu1 %v898_v26, %s1556_s18 }
 0x35d   :  { %v840_v28 = vpop.f32.mrb[16].mxu1  ;;  %v994_v29 = vpop.f32.mrb[28].mxu0 }
 0x35e   :  { %v1440_v31 = vpop.f32.mrb[17].mxu1  ;;  %v1458_v33 = vpop.f32.mrb[29].mxu0 }
 0x35f   :  { %v843_v35 = vpop.f32.mrb[18].mxu1  ;;  %v997_v37 = vpop.f32.mrb[30].mxu0 }
 0x360   :  { %v896_v38 = vpack.c.bf16 %v843_v35, %v840_v28  ;;  %v1050_v39 = vpack.c.bf16 %v997_v37, %v994_v29  ;;  %v1441_v40 = vpop.f32.mrb[19].mxu1  ;;  %v1459_v41 = vpop.f32.mrb[31].mxu0 }
 0x362   :  { %897 = vst.msk [vmem:[#allocation2 + $0x10] sm:$0xff] %vm587_vm6, %v896_v38  ;;  %1051 = vst.msk [vmem:[#allocation2 + $0x18] sm:$0xff] %vm587_vm6, %v1050_v39 }
 0x365   :  { %v1043_v42 = vpop.f32.mrb[20].mxu1 }
 0x366   :  { %v1464_v43 = vpop.f32.mrb[21].mxu1 }
 0x367   :  { %v1046_v44 = vpop.f32.mrb[22].mxu1 }
 0x368   :  { %v1052_v45 = vpack.c.bf16 %v1046_v44, %v1043_v42  ;;  %v1465_v46 = vpop.f32.mrb[23].mxu1 }
 0x36a   :  { %1054 = vrot.lane.b32.xlu0 %v1052_v45, %s1556_s18 }
 0x3b8   :  { %v592_v47 = vpop.permute.xlu1 %591 }
 0x3b9   :  { %595 = vst.msk [vmem:[#allocation2] sm:$0xff] %vm594_vm7, %v592_v47 }
 0x3c0   :  { %v747_v48 = vpop.permute.xlu0 %746  ;;  %v1058_v49 = vld [vmem:[#allocation2] sm:$0xff]  ;;  %v901_v50 = vpop.permute.xlu1 %900 }
 0x3c1   :  { %749 = vst.msk [vmem:[#allocation2 + $0x8] sm:$0xff] %vm594_vm7, %v747_v48  ;;  %1472 = vmatprep.mubr.msk.bf16.mxu1 %vm106_vm3, %v1058_v49  ;;  %903 = vst.msk [vmem:[#allocation2 + $0x10] sm:$0xff] %vm594_vm7, %v901_v50 }
 0x3c8   :  { %v1059_v51 = vld [vmem:[#allocation2 + $0x8] sm:$0xff]  ;;  %v1060_v52 = vld [vmem:[#allocation2 + $0x10] sm:$0xff] }
 0x3c9   :  { %1473 = vmatmul.mubr.msk.bf16.vlgmr.msra.gmra.mrb[24].mxu1 %vm106_vm3, %v1059_v51 }
 0x3ca   :  { %1476 = vmatprep.mubr.msk.bf16.mxu1 %vm106_vm3, %v1060_v52 }
 0x3dc   :  { %v1055_v53 = vpop.permute.xlu0 %1054 }
 0x3dd   :  { %1057 = vst.msk [vmem:[#allocation2 + $0x18] sm:$0xff] %vm594_vm7, %v1055_v53 }
 0x3e4   :  { %v1061_v54 = vld [vmem:[#allocation2 + $0x18] sm:$0xff] }
 0x3e5   :  { %1477 = vmatmul.mubr.msk.bf16.gmra.mrb[28].mxu1 %vm106_vm3, %v1061_v54 }
 0x49c   :  { %v1474_v56 = vpop.f32.mrb[24].mxu1 }
 0x49d   :  { %v1141_v57 = vadd.f32 %v1474_v56, %v1293_v55  ;;  %v1132_v58 = vpop.f32.mrb[25].mxu1 }
 0x49e   :  { %v1133_v59 = vadd.f32 %v1293_v55, %v1132_v58  ;;  %v1475_v60 = vpop.f32.mrb[26].mxu1 }
 0x49f   :  { %v1165_v61 = vmax.f32 %v1141_v57, 0.0  ;;  %v1144_v62 = vadd.f32 %v1475_v60, %v1293_v55  ;;  %v1135_v63 = vpop.f32.mrb[27].mxu1 }
 0x4a0   :  { %v1163_v0 = vmax.f32 %v1133_v59, 0.0  ;;  %v1136_v2 = vadd.f32 %v1293_v55, %v1135_v63 }
 0x4a1   :  { %v1166_v4 = vmax.f32 %v1144_v62, 0.0  ;;  %v1188_v5 = vmul.f32 %v1187_v1, %v1165_v61 }
 0x4a2   :  { %v1164_v6 = vmax.f32 %v1136_v2, 0.0  ;;  %v1174_v7 = vmul.f32 %v1173_v3, %v1163_v0 }
 0x4a3   :  { %1193 = vrot.lane.b32.xlu0 %v1166_v4, %s1556_s18  ;;  %v1189_v8 = vadd.f32 %v1188_v5, %v1675_v20 }
 0x4a4   :  { %1178 = vrot.lane.b32.xlu1 %v1164_v6, %s1556_s18  ;;  %v1175_v9 = vadd.f32 %v1174_v7, %v1678_v22 }
 0x4a5   :  { %1302 = vst.msk [vmem:[%s1848_s7 + $0x8] sm:$0xff] %vm587_vm6, %v1189_v8 }
 0x4a6   :  { %1176 = vst.msk [vmem:[%s1848_s7] sm:$0xff] %vm587_vm6, %v1175_v9 }
 0x4b8   :  { %v1478_v16 = vpop.f32.mrb[28].mxu1 }
 0x4b9   :  { %v1157_v19 = vadd.f32 %v1478_v16, %v1293_v55  ;;  %v1148_v10 = vpop.f32.mrb[29].mxu1 }
 0x4ba   :  { %v1149_v11 = vadd.f32 %v1293_v55, %v1148_v10  ;;  %v1479_v12 = vpop.f32.mrb[30].mxu1 }
 0x4bb   :  { %v1169_v13 = vmax.f32 %v1157_v19, 0.0  ;;  %v1160_v14 = vadd.f32 %v1479_v12, %v1293_v55  ;;  %v1151_v15 = vpop.f32.mrb[31].mxu1 }
 0x4bc   :  { %v1167_v18 = vmax.f32 %v1149_v11, 0.0  ;;  %v1152_v21 = vadd.f32 %v1293_v55, %v1151_v15 }
 0x4bd   :  { %v1170_v24 = vmax.f32 %v1160_v14, 0.0  ;;  %v1216_v25 = vmul.f32 %v1215_v17, %v1169_v13 }
 0x4be   :  { %v1168_v26 = vmax.f32 %v1152_v21, 0.0  ;;  %v1202_v27 = vmul.f32 %v1201_v23, %v1167_v18 }
 0x4bf   :  { %1221 = vrot.lane.b32.xlu0 %v1170_v24, %s1556_s18  ;;  %v1217_v28 = vadd.f32 %v1216_v25, %v1698_v34 }
 0x4c0   :  { %1207 = vrot.lane.b32.xlu1 %v1168_v26, %s1556_s18  ;;  %v1203_v29 = vadd.f32 %v1202_v27, %v1701_v36 }
 0x4c1   :  { %1308 = vst.msk [vmem:[%s1848_s7 + $0x18] sm:$0xff] %vm587_vm6, %v1217_v28 }
 0x4c2   :  { %1305 = vst.msk [vmem:[%s1848_s7 + $0x10] sm:$0xff] %vm587_vm6, %v1203_v29 }
 0x515   :  { %v1194_v30 = vpop.permute.xlu0 %1193 }
 0x516   :  { %v1196_v32 = vmul.f32 %v1194_v30, %v1187_v1  ;;  %v1179_v31 = vpop.permute.xlu1 %1178 }
 0x517   :  { %v1181_v33 = vmul.f32 %v1179_v31, %v1173_v3 }
 0x518   :  { %v1197_v35 = vadd.f32 %v1196_v32, %v1675_v20 }
 0x519   :  { %v1182_v37 = vadd.f32 %v1181_v33, %v1678_v22 }
 0x51a   :  { %1303 = vst.msk [vmem:[%s1848_s7 + $0x8] sm:$0xff] %vm1183_vm8, %v1197_v35 }
 0x51b   :  { %1184 = vst.msk [vmem:[%s1848_s7] sm:$0xff] %vm1183_vm8, %v1182_v37 }
 0x531   :  { %v1222_v38 = vpop.permute.xlu0 %1221 }
 0x532   :  { %v1224_v39 = vmul.f32 %v1222_v38, %v1215_v17  ;;  %v1208_v40 = vpop.permute.xlu1 %1207 }
 0x533   :  { %v1210_v41 = vmul.f32 %v1208_v40, %v1201_v23 }
 0x534   :  { %v1225_v42 = vadd.f32 %v1224_v39, %v1698_v34 }
 0x535   :  { %v1211_v43 = vadd.f32 %v1210_v41, %v1701_v36 }
 0x536   :  { %1309 = vst.msk [vmem:[%s1848_s7 + $0x18] sm:$0xff] %vm1183_vm8, %v1225_v42 }
 0x537   :  { %1306 = vst.msk [vmem:[%s1848_s7 + $0x10] sm:$0xff] %vm1183_vm8, %v1211_v43 }

</bundles_post_ra>
